<compile_context>
chip_gen: v7x
topology: tpu7x:2x2x1
jax: 0.10.0
libtpu: 0.0.40
codegen_flags: <defaults>
</compile_context>

<pallas_src>
import functools

import jax
import jax.numpy as jnp
import numpy as np
from jax.experimental import pallas as pl
from jax.experimental.pallas import tpu as pltpu


# ----------------------------- fused GRU kernel -------------------------------
def gru_fused_kernel(emb_ref,                 # (T*Bp, 2E) row block t = [emb_t | emb_{T-1-t}]
                     h0_ref,                  # (Bp, 2H)   [h0_fwd | h0_bwd]
                     wih_ref,                 # (2E, 6H)   block-diag, cols [r_f r_b z_f z_b n_f n_b]
                     whh_ref,                 # (2H, 6H)   block-diag, same column order
                     wlf_ref, wlb_ref,        # (H, L)     final projection split per direction
                     bgi_ref,                 # (1, 6H)    b_ih + (r,z thirds of) b_hh
                     bhn_ref,                 # (1, 2H)    [b_hn_f | b_hn_b]
                     blin_ref,                # (1, L)
                     o_ref,                   # (T*Bp, L)  time-major logits
                     *, T, Bp, H):
    # ---- prologue (off the serial path): one fused input projection ---------
    gi_all = (jnp.dot(emb_ref[...], wih_ref[...],
                      preferred_element_type=jnp.float32) + bgi_ref[...])

    whh = whh_ref[...]
    # Hoisted broadcast: only the n-gate hidden bias stays inside the loop.
    bhn = jnp.broadcast_to(bhn_ref[...], (Bp, 2 * H))

    h = h0_ref[...]                      # (Bp, 2H) = [hf | hb], register-resident
    hist = []                            # per-step hidden states stay in vregs

    # ---- recurrence: fully unrolled, ONE block-diagonal matmul per step -----
    for t in range(T):
        gi = gi_all[t * Bp:(t + 1) * Bp, :]                  # sublane-aligned slice
        gh = jnp.dot(h, whh, preferred_element_type=jnp.float32)   # (Bp, 6H)
        # fused sigmoid over the contiguous r|z slab (both directions)
        rz = jax.nn.sigmoid(gi[:, :4 * H] + gh[:, :4 * H])
        r = rz[:, :2 * H]                                    # [r_f | r_b]
        z = rz[:, 2 * H:]                                    # [z_f | z_b]
        n = jnp.tanh(gi[:, 4 * H:] + r * (gh[:, 4 * H:] + bhn))
        h = (1.0 - z) * n + z * h
        hist.append(h)

    # ---- epilogue: realign backward direction to time order, project --------
    hf_all = jnp.concatenate([hist[t][:, :H] for t in range(T)], axis=0)
    hb_all = jnp.concatenate([hist[T - 1 - t][:, H:] for t in range(T)], axis=0)
    o_ref[...] = (jnp.dot(hf_all, wlf_ref[...], preferred_element_type=jnp.float32)
                  + jnp.dot(hb_all, wlb_ref[...], preferred_element_type=jnp.float32)
                  + blin_ref[...])


# ----------------------------- full model forward -----------------------------
def gru_model_forward(text_ids, params, h0f, h0b):
    B, T = text_ids.shape
    E = params["embedding"].shape[1]
    H = h0f.shape[-1]
    L = params["w_lin"].shape[-1]
    Bp = max(8, ((B + 7) // 8) * 8)      # pad batch to the f32 sublane tile

    def split3(w):
        return w[..., :H], w[..., H:2 * H], w[..., 2 * H:]

    # ---- fused, gate-major, block-diagonal weights (built once, tiny) -------
    wfi_r, wfi_z, wfi_n = split3(params["wih_f"])
    wbi_r, wbi_z, wbi_n = split3(params["wih_b"])
    wfh_r, wfh_z, wfh_n = split3(params["whh_f"])
    wbh_r, wbh_z, wbh_n = split3(params["whh_b"])
    zE = jnp.zeros((E, H), jnp.float32)
    zH = jnp.zeros((H, H), jnp.float32)

    def blk(f, b, z):                    # -> [[f, 0], [0, b]]  (two gate columns)
        return jnp.concatenate([jnp.concatenate([f, z], axis=0),
                                jnp.concatenate([z, b], axis=0)], axis=1)

    wih_blk = jnp.concatenate([blk(wfi_r, wbi_r, zE), blk(wfi_z, wbi_z, zE),
                               blk(wfi_n, wbi_n, zE)], axis=1)       # (2E, 6H)
    whh_blk = jnp.concatenate([blk(wfh_r, wbh_r, zH), blk(wfh_z, wbh_z, zH),
                               blk(wfh_n, wbh_n, zH)], axis=1)       # (2H, 6H)

    bfi_r, bfi_z, bfi_n = split3(params["bih_f"])
    bbi_r, bbi_z, bbi_n = split3(params["bih_b"])
    bfh_r, bfh_z, bfh_n = split3(params["bhh_f"])
    bbh_r, bbh_z, bbh_n = split3(params["bhh_b"])
    bias_gi = jnp.concatenate([bfi_r + bfh_r, bbi_r + bbh_r,
                               bfi_z + bfh_z, bbi_z + bbh_z,
                               bfi_n, bbi_n], axis=1)                # (1, 6H)
    bhn = jnp.concatenate([bfh_n, bbh_n], axis=1)                    # (1, 2H)
    blin = params["b_lin"].reshape(1, L)
    wlf = params["w_lin"][:H, :]
    wlb = params["w_lin"][H:, :]

    # ---- activations: time-major, batch padded to Bp, directions fused ------
    emb_tm = params["embedding"][text_ids.T]                         # (T, B, E)
    emb_tm = jnp.pad(emb_tm, ((0, 0), (0, Bp - B), (0, 0)))
    emb_fused = jnp.concatenate([emb_tm, emb_tm[::-1]], axis=-1)     # (T, Bp, 2E)
    emb_fused = emb_fused.reshape(T * Bp, 2 * E)

    h0_cat = jnp.concatenate([jnp.pad(h0f, ((0, Bp - B), (0, 0))),
                              jnp.pad(h0b, ((0, Bp - B), (0, 0)))], axis=1)

    vmem = pl.BlockSpec(memory_space=pltpu.MemorySpace.VMEM)
    preds_flat = pl.pallas_call(
        functools.partial(gru_fused_kernel, T=T, Bp=Bp, H=H),
        out_shape=jax.ShapeDtypeStruct((T * Bp, L), jnp.float32),
        in_specs=[vmem] * 9,
        out_specs=vmem,
    )(emb_fused, h0_cat, wih_blk, whh_blk, wlf, wlb, bias_gi, bhn, blin)

    # Only the tiny (T, Bp, L) logits get reshaped/sliced/transposed outside.
    return preds_flat.reshape(T, Bp, L)[:, :B, :].transpose(1, 0, 2)  # (B, T, L)


# ----------------------------- pure-JAX reference ------------------------------
def gru_reference(text_ids, params, h0f, h0b):
    emb = params["embedding"][text_ids]
    B, T, E = emb.shape
    H = h0f.shape[-1]

    def cell(x, h, wih, whh, bih, bhh):
        gi = x @ wih + bih
        gh = h @ whh + bhh
        i_r, i_z, i_n = gi[:, :H], gi[:, H:2 * H], gi[:, 2 * H:]
        h_r, h_z, h_n = gh[:, :H], gh[:, H:2 * H], gh[:, 2 * H:]
        r = jax.nn.sigmoid(i_r + h_r)
        z = jax.nn.sigmoid(i_z + h_z)
        n = jnp.tanh(i_n + r * h_n)
        return (1.0 - z) * n + z * h

    h = h0f
    out_f = []
    for i in range(T):
        h = cell(emb[:, i, :], h, params["wih_f"], params["whh_f"],
                 params["bih_f"][0], params["bhh_f"][0])
        out_f.append(h)
    out_f = jnp.stack(out_f, axis=1)

    h = h0b
    out_b = []
    for i in range(T - 1, -1, -1):
        h = cell(emb[:, i, :], h, params["wih_b"], params["whh_b"],
                 params["bih_b"][0], params["bhh_b"][0])
        out_b = [h] + out_b
    out_b = jnp.stack(out_b, axis=1)

    out = jnp.concatenate([out_f, out_b], axis=2)
    return out @ params["w_lin"] + params["b_lin"]


# ----------------------------------- main --------------------------------------
if __name__ == "__main__":
    VOCAB, EMB, HID, LABELS = 50, 32, 32, 4
    B, T = 2, 8

    key = jax.random.PRNGKey(0)
    ks = jax.random.split(key, 16)
    u = lambda k, shape, s: jax.random.uniform(k, shape, jnp.float32, -s, s)
    sH = 1.0 / np.sqrt(HID)

    params = {
        "embedding": jax.random.normal(ks[0], (VOCAB, EMB), jnp.float32),
        # GRUCell weights stored transposed: (in, 3H) / (H, 3H); biases (1, 3H)
        "wih_f": u(ks[1], (EMB, 3 * HID), sH), "whh_f": u(ks[2], (HID, 3 * HID), sH),
        "bih_f": u(ks[3], (1, 3 * HID), sH),   "bhh_f": u(ks[4], (1, 3 * HID), sH),
        "wih_b": u(ks[5], (EMB, 3 * HID), sH), "whh_b": u(ks[6], (HID, 3 * HID), sH),
        "bih_b": u(ks[7], (1, 3 * HID), sH),   "bhh_b": u(ks[8], (1, 3 * HID), sH),
        "w_lin": u(ks[9], (2 * HID, LABELS), 1.0 / np.sqrt(2 * HID)),
        "b_lin": u(ks[10], (LABELS,), 1.0 / np.sqrt(2 * HID)),
    }

    # batch.text equivalent: integer token ids (B, T)
    text_ids = jax.random.randint(ks[11], (B, T), 0, VOCAB)

    # deterministic stand-in for torch.rand h0:  (rand - 0.5) / hidden_unit
    h0f = (jax.random.uniform(ks[12], (B, HID), jnp.float32) - 0.5) / HID
    h0b = (jax.random.uniform(ks[13], (B, HID), jnp.float32) - 0.5) / HID

    preds = gru_model_forward(text_ids, params, h0f, h0b)
    preds = jax.block_until_ready(preds)

    ref = gru_reference(text_ids, params, h0f, h0b)
    np.testing.assert_allclose(np.asarray(preds), np.asarray(ref),
                               rtol=1e-5, atol=1e-5)
    assert preds.shape == (B, T, LABELS)
    print("KERNEL_OK")
</pallas_src>

<mosaic_0001>
module attributes {stable_mosaic.version = 11 : i64} {
  func.func @gru_fused_kernel(%arg0: memref<64x64xf32, #tpu.memory_space<vmem>>, %arg1: memref<8x64xf32, #tpu.memory_space<vmem>>, %arg2: memref<64x192xf32, #tpu.memory_space<vmem>>, %arg3: memref<64x192xf32, #tpu.memory_space<vmem>>, %arg4: memref<32x4xf32, #tpu.memory_space<vmem>>, %arg5: memref<32x4xf32, #tpu.memory_space<vmem>>, %arg6: memref<1x192xf32, #tpu.memory_space<vmem>>, %arg7: memref<1x64xf32, #tpu.memory_space<vmem>>, %arg8: memref<1x4xf32, #tpu.memory_space<vmem>>, %arg9: memref<64x4xf32, #tpu.memory_space<vmem>>) attributes {dimension_semantics = [], scalar_prefetch = 0 : i64, scratch_operands = 0 : i64, tpu.core_type = #tpu.core_type<tc>} {
    %c0 = arith.constant 0 : index
    %c0_0 = arith.constant 0 : index
    %0 = vector.load %arg0[%c0, %c0_0] : memref<64x64xf32, #tpu.memory_space<vmem>>, vector<64x64xf32>
    %c0_1 = arith.constant 0 : index
    %c0_2 = arith.constant 0 : index
    %1 = vector.load %arg2[%c0_1, %c0_2] : memref<64x192xf32, #tpu.memory_space<vmem>>, vector<64x192xf32>
    %cst = arith.constant dense<0.000000e+00> : vector<64x192xf32>
    %2 = tpu.matmul %0, %1, %cst {dimension_numbers = #tpu.dot_dimension_numbers<[1], [0], [0], [1], [0, 0, 1, 1], [], []>} : vector<64x64xf32>, vector<64x192xf32>, vector<64x192xf32> -> vector<64x192xf32>
    %c0_3 = arith.constant 0 : index
    %c0_4 = arith.constant 0 : index
    %3 = vector.load %arg6[%c0_3, %c0_4] : memref<1x192xf32, #tpu.memory_space<vmem>>, vector<1x192xf32>
    %4 = vector.broadcast %3 : vector<1x192xf32> to vector<64x192xf32>
    %5 = arith.addf %2, %4 : vector<64x192xf32>
    %c0_5 = arith.constant 0 : index
    %c0_6 = arith.constant 0 : index
    %6 = vector.load %arg3[%c0_5, %c0_6] : memref<64x192xf32, #tpu.memory_space<vmem>>, vector<64x192xf32>
    %c0_7 = arith.constant 0 : index
    %c0_8 = arith.constant 0 : index
    %7 = vector.load %arg7[%c0_7, %c0_8] : memref<1x64xf32, #tpu.memory_space<vmem>>, vector<1x64xf32>
    %8 = vector.shape_cast %7 : vector<1x64xf32> to vector<1x64xf32>
    %9 = vector.broadcast %8 : vector<1x64xf32> to vector<8x64xf32>
    %c0_9 = arith.constant 0 : index
    %c0_10 = arith.constant 0 : index
    %10 = vector.load %arg1[%c0_9, %c0_10] : memref<8x64xf32, #tpu.memory_space<vmem>>, vector<8x64xf32>
    %11 = vector.extract_strided_slice %5 {offsets = [0, 0], sizes = [8, 192], strides = [1, 1]} : vector<64x192xf32> to vector<8x192xf32>
    %cst_11 = arith.constant dense<0.000000e+00> : vector<8x192xf32>
    %12 = tpu.matmul %10, %6, %cst_11 {dimension_numbers = #tpu.dot_dimension_numbers<[1], [0], [0], [1], [0, 0, 1, 1], [], []>} : vector<8x64xf32>, vector<64x192xf32>, vector<8x192xf32> -> vector<8x192xf32>
    %13 = vector.extract_strided_slice %11 {offsets = [0, 0], sizes = [8, 128], strides = [1, 1]} : vector<8x192xf32> to vector<8x128xf32>
    %14 = vector.extract_strided_slice %12 {offsets = [0, 0], sizes = [8, 128], strides = [1, 1]} : vector<8x192xf32> to vector<8x128xf32>
    %15 = arith.addf %13, %14 : vector<8x128xf32>
    %16 = arith.negf %15 : vector<8x128xf32>
    %17 = math.exp %16 : vector<8x128xf32>
    %cst_12 = arith.constant 1.000000e+00 : f32
    %18 = vector.broadcast %cst_12 : f32 to vector<8x128xf32>
    %19 = arith.addf %18, %17 : vector<8x128xf32>
    %20 = arith.divf %18, %19 : vector<8x128xf32>
    %21 = vector.extract_strided_slice %20 {offsets = [0, 0], sizes = [8, 64], strides = [1, 1]} : vector<8x128xf32> to vector<8x64xf32>
    %22 = vector.extract_strided_slice %20 {offsets = [0, 64], sizes = [8, 64], strides = [1, 1]} : vector<8x128xf32> to vector<8x64xf32>
    %23 = vector.extract_strided_slice %11 {offsets = [0, 128], sizes = [8, 64], strides = [1, 1]} : vector<8x192xf32> to vector<8x64xf32>
    %24 = vector.extract_strided_slice %12 {offsets = [0, 128], sizes = [8, 64], strides = [1, 1]} : vector<8x192xf32> to vector<8x64xf32>
    %25 = arith.addf %24, %9 : vector<8x64xf32>
    %26 = arith.mulf %21, %25 : vector<8x64xf32>
    %27 = arith.addf %23, %26 : vector<8x64xf32>
    %28 = math.tanh %27 : vector<8x64xf32>
    %cst_13 = arith.constant 1.000000e+00 : f32
    %29 = vector.broadcast %cst_13 : f32 to vector<8x64xf32>
    %30 = arith.subf %29, %22 : vector<8x64xf32>
    %31 = arith.mulf %30, %28 : vector<8x64xf32>
    %32 = arith.mulf %22, %10 : vector<8x64xf32>
    %33 = arith.addf %31, %32 : vector<8x64xf32>
    %34 = vector.extract_strided_slice %5 {offsets = [8, 0], sizes = [8, 192], strides = [1, 1]} : vector<64x192xf32> to vector<8x192xf32>
    %cst_14 = arith.constant dense<0.000000e+00> : vector<8x192xf32>
    %35 = tpu.matmul %33, %6, %cst_14 {dimension_numbers = #tpu.dot_dimension_numbers<[1], [0], [0], [1], [0, 0, 1, 1], [], []>} : vector<8x64xf32>, vector<64x192xf32>, vector<8x192xf32> -> vector<8x192xf32>
    %36 = vector.extract_strided_slice %34 {offsets = [0, 0], sizes = [8, 128], strides = [1, 1]} : vector<8x192xf32> to vector<8x128xf32>
    %37 = vector.extract_strided_slice %35 {offsets = [0, 0], sizes = [8, 128], strides = [1, 1]} : vector<8x192xf32> to vector<8x128xf32>
    %38 = arith.addf %36, %37 : vector<8x128xf32>
    %39 = arith.negf %38 : vector<8x128xf32>
    %40 = math.exp %39 : vector<8x128xf32>
    %cst_15 = arith.constant 1.000000e+00 : f32
    %41 = vector.broadcast %cst_15 : f32 to vector<8x128xf32>
    %42 = arith.addf %41, %40 : vector<8x128xf32>
    %43 = arith.divf %41, %42 : vector<8x128xf32>
    %44 = vector.extract_strided_slice %43 {offsets = [0, 0], sizes = [8, 64], strides = [1, 1]} : vector<8x128xf32> to vector<8x64xf32>
    %45 = vector.extract_strided_slice %43 {offsets = [0, 64], sizes = [8, 64], strides = [1, 1]} : vector<8x128xf32> to vector<8x64xf32>
    %46 = vector.extract_strided_slice %34 {offsets = [0, 128], sizes = [8, 64], strides = [1, 1]} : vector<8x192xf32> to vector<8x64xf32>
    %47 = vector.extract_strided_slice %35 {offsets = [0, 128], sizes = [8, 64], strides = [1, 1]} : vector<8x192xf32> to vector<8x64xf32>
    %48 = arith.addf %47, %9 : vector<8x64xf32>
    %49 = arith.mulf %44, %48 : vector<8x64xf32>
    %50 = arith.addf %46, %49 : vector<8x64xf32>
    %51 = math.tanh %50 : vector<8x64xf32>
    %cst_16 = arith.constant 1.000000e+00 : f32
    %52 = vector.broadcast %cst_16 : f32 to vector<8x64xf32>
    %53 = arith.subf %52, %45 : vector<8x64xf32>
    %54 = arith.mulf %53, %51 : vector<8x64xf32>
    %55 = arith.mulf %45, %33 : vector<8x64xf32>
    %56 = arith.addf %54, %55 : vector<8x64xf32>
    %57 = vector.extract_strided_slice %5 {offsets = [16, 0], sizes = [8, 192], strides = [1, 1]} : vector<64x192xf32> to vector<8x192xf32>
    %cst_17 = arith.constant dense<0.000000e+00> : vector<8x192xf32>
    %58 = tpu.matmul %56, %6, %cst_17 {dimension_numbers = #tpu.dot_dimension_numbers<[1], [0], [0], [1], [0, 0, 1, 1], [], []>} : vector<8x64xf32>, vector<64x192xf32>, vector<8x192xf32> -> vector<8x192xf32>
    %59 = vector.extract_strided_slice %57 {offsets = [0, 0], sizes = [8, 128], strides = [1, 1]} : vector<8x192xf32> to vector<8x128xf32>
    %60 = vector.extract_strided_slice %58 {offsets = [0, 0], sizes = [8, 128], strides = [1, 1]} : vector<8x192xf32> to vector<8x128xf32>
    %61 = arith.addf %59, %60 : vector<8x128xf32>
    %62 = arith.negf %61 : vector<8x128xf32>
    %63 = math.exp %62 : vector<8x128xf32>
    %cst_18 = arith.constant 1.000000e+00 : f32
    %64 = vector.broadcast %cst_18 : f32 to vector<8x128xf32>
    %65 = arith.addf %64, %63 : vector<8x128xf32>
    %66 = arith.divf %64, %65 : vector<8x128xf32>
    %67 = vector.extract_strided_slice %66 {offsets = [0, 0], sizes = [8, 64], strides = [1, 1]} : vector<8x128xf32> to vector<8x64xf32>
    %68 = vector.extract_strided_slice %66 {offsets = [0, 64], sizes = [8, 64], strides = [1, 1]} : vector<8x128xf32> to vector<8x64xf32>
    %69 = vector.extract_strided_slice %57 {offsets = [0, 128], sizes = [8, 64], strides = [1, 1]} : vector<8x192xf32> to vector<8x64xf32>
    %70 = vector.extract_strided_slice %58 {offsets = [0, 128], sizes = [8, 64], strides = [1, 1]} : vector<8x192xf32> to vector<8x64xf32>
    %71 = arith.addf %70, %9 : vector<8x64xf32>
    %72 = arith.mulf %67, %71 : vector<8x64xf32>
    %73 = arith.addf %69, %72 : vector<8x64xf32>
    %74 = math.tanh %73 : vector<8x64xf32>
    %cst_19 = arith.constant 1.000000e+00 : f32
    %75 = vector.broadcast %cst_19 : f32 to vector<8x64xf32>
    %76 = arith.subf %75, %68 : vector<8x64xf32>
    %77 = arith.mulf %76, %74 : vector<8x64xf32>
    %78 = arith.mulf %68, %56 : vector<8x64xf32>
    %79 = arith.addf %77, %78 : vector<8x64xf32>
    %80 = vector.extract_strided_slice %5 {offsets = [24, 0], sizes = [8, 192], strides = [1, 1]} : vector<64x192xf32> to vector<8x192xf32>
    %cst_20 = arith.constant dense<0.000000e+00> : vector<8x192xf32>
    %81 = tpu.matmul %79, %6, %cst_20 {dimension_numbers = #tpu.dot_dimension_numbers<[1], [0], [0], [1], [0, 0, 1, 1], [], []>} : vector<8x64xf32>, vector<64x192xf32>, vector<8x192xf32> -> vector<8x192xf32>
    %82 = vector.extract_strided_slice %80 {offsets = [0, 0], sizes = [8, 128], strides = [1, 1]} : vector<8x192xf32> to vector<8x128xf32>
    %83 = vector.extract_strided_slice %81 {offsets = [0, 0], sizes = [8, 128], strides = [1, 1]} : vector<8x192xf32> to vector<8x128xf32>
    %84 = arith.addf %82, %83 : vector<8x128xf32>
    %85 = arith.negf %84 : vector<8x128xf32>
    %86 = math.exp %85 : vector<8x128xf32>
    %cst_21 = arith.constant 1.000000e+00 : f32
    %87 = vector.broadcast %cst_21 : f32 to vector<8x128xf32>
    %88 = arith.addf %87, %86 : vector<8x128xf32>
    %89 = arith.divf %87, %88 : vector<8x128xf32>
    %90 = vector.extract_strided_slice %89 {offsets = [0, 0], sizes = [8, 64], strides = [1, 1]} : vector<8x128xf32> to vector<8x64xf32>
    %91 = vector.extract_strided_slice %89 {offsets = [0, 64], sizes = [8, 64], strides = [1, 1]} : vector<8x128xf32> to vector<8x64xf32>
    %92 = vector.extract_strided_slice %80 {offsets = [0, 128], sizes = [8, 64], strides = [1, 1]} : vector<8x192xf32> to vector<8x64xf32>
    %93 = vector.extract_strided_slice %81 {offsets = [0, 128], sizes = [8, 64], strides = [1, 1]} : vector<8x192xf32> to vector<8x64xf32>
    %94 = arith.addf %93, %9 : vector<8x64xf32>
    %95 = arith.mulf %90, %94 : vector<8x64xf32>
    %96 = arith.addf %92, %95 : vector<8x64xf32>
    %97 = math.tanh %96 : vector<8x64xf32>
    %cst_22 = arith.constant 1.000000e+00 : f32
    %98 = vector.broadcast %cst_22 : f32 to vector<8x64xf32>
    %99 = arith.subf %98, %91 : vector<8x64xf32>
    %100 = arith.mulf %99, %97 : vector<8x64xf32>
    %101 = arith.mulf %91, %79 : vector<8x64xf32>
    %102 = arith.addf %100, %101 : vector<8x64xf32>
    %103 = vector.extract_strided_slice %5 {offsets = [32, 0], sizes = [8, 192], strides = [1, 1]} : vector<64x192xf32> to vector<8x192xf32>
    %cst_23 = arith.constant dense<0.000000e+00> : vector<8x192xf32>
    %104 = tpu.matmul %102, %6, %cst_23 {dimension_numbers = #tpu.dot_dimension_numbers<[1], [0], [0], [1], [0, 0, 1, 1], [], []>} : vector<8x64xf32>, vector<64x192xf32>, vector<8x192xf32> -> vector<8x192xf32>
    %105 = vector.extract_strided_slice %103 {offsets = [0, 0], sizes = [8, 128], strides = [1, 1]} : vector<8x192xf32> to vector<8x128xf32>
    %106 = vector.extract_strided_slice %104 {offsets = [0, 0], sizes = [8, 128], strides = [1, 1]} : vector<8x192xf32> to vector<8x128xf32>
    %107 = arith.addf %105, %106 : vector<8x128xf32>
    %108 = arith.negf %107 : vector<8x128xf32>
    %109 = math.exp %108 : vector<8x128xf32>
    %cst_24 = arith.constant 1.000000e+00 : f32
    %110 = vector.broadcast %cst_24 : f32 to vector<8x128xf32>
    %111 = arith.addf %110, %109 : vector<8x128xf32>
    %112 = arith.divf %110, %111 : vector<8x128xf32>
    %113 = vector.extract_strided_slice %112 {offsets = [0, 0], sizes = [8, 64], strides = [1, 1]} : vector<8x128xf32> to vector<8x64xf32>
    %114 = vector.extract_strided_slice %112 {offsets = [0, 64], sizes = [8, 64], strides = [1, 1]} : vector<8x128xf32> to vector<8x64xf32>
    %115 = vector.extract_strided_slice %103 {offsets = [0, 128], sizes = [8, 64], strides = [1, 1]} : vector<8x192xf32> to vector<8x64xf32>
    %116 = vector.extract_strided_slice %104 {offsets = [0, 128], sizes = [8, 64], strides = [1, 1]} : vector<8x192xf32> to vector<8x64xf32>
    %117 = arith.addf %116, %9 : vector<8x64xf32>
    %118 = arith.mulf %113, %117 : vector<8x64xf32>
    %119 = arith.addf %115, %118 : vector<8x64xf32>
    %120 = math.tanh %119 : vector<8x64xf32>
    %cst_25 = arith.constant 1.000000e+00 : f32
    %121 = vector.broadcast %cst_25 : f32 to vector<8x64xf32>
    %122 = arith.subf %121, %114 : vector<8x64xf32>
    %123 = arith.mulf %122, %120 : vector<8x64xf32>
    %124 = arith.mulf %114, %102 : vector<8x64xf32>
    %125 = arith.addf %123, %124 : vector<8x64xf32>
    %126 = vector.extract_strided_slice %5 {offsets = [40, 0], sizes = [8, 192], strides = [1, 1]} : vector<64x192xf32> to vector<8x192xf32>
    %cst_26 = arith.constant dense<0.000000e+00> : vector<8x192xf32>
    %127 = tpu.matmul %125, %6, %cst_26 {dimension_numbers = #tpu.dot_dimension_numbers<[1], [0], [0], [1], [0, 0, 1, 1], [], []>} : vector<8x64xf32>, vector<64x192xf32>, vector<8x192xf32> -> vector<8x192xf32>
    %128 = vector.extract_strided_slice %126 {offsets = [0, 0], sizes = [8, 128], strides = [1, 1]} : vector<8x192xf32> to vector<8x128xf32>
    %129 = vector.extract_strided_slice %127 {offsets = [0, 0], sizes = [8, 128], strides = [1, 1]} : vector<8x192xf32> to vector<8x128xf32>
    %130 = arith.addf %128, %129 : vector<8x128xf32>
    %131 = arith.negf %130 : vector<8x128xf32>
    %132 = math.exp %131 : vector<8x128xf32>
    %cst_27 = arith.constant 1.000000e+00 : f32
    %133 = vector.broadcast %cst_27 : f32 to vector<8x128xf32>
    %134 = arith.addf %133, %132 : vector<8x128xf32>
    %135 = arith.divf %133, %134 : vector<8x128xf32>
    %136 = vector.extract_strided_slice %135 {offsets = [0, 0], sizes = [8, 64], strides = [1, 1]} : vector<8x128xf32> to vector<8x64xf32>
    %137 = vector.extract_strided_slice %135 {offsets = [0, 64], sizes = [8, 64], strides = [1, 1]} : vector<8x128xf32> to vector<8x64xf32>
    %138 = vector.extract_strided_slice %126 {offsets = [0, 128], sizes = [8, 64], strides = [1, 1]} : vector<8x192xf32> to vector<8x64xf32>
    %139 = vector.extract_strided_slice %127 {offsets = [0, 128], sizes = [8, 64], strides = [1, 1]} : vector<8x192xf32> to vector<8x64xf32>
    %140 = arith.addf %139, %9 : vector<8x64xf32>
    %141 = arith.mulf %136, %140 : vector<8x64xf32>
    %142 = arith.addf %138, %141 : vector<8x64xf32>
    %143 = math.tanh %142 : vector<8x64xf32>
    %cst_28 = arith.constant 1.000000e+00 : f32
    %144 = vector.broadcast %cst_28 : f32 to vector<8x64xf32>
    %145 = arith.subf %144, %137 : vector<8x64xf32>
    %146 = arith.mulf %145, %143 : vector<8x64xf32>
    %147 = arith.mulf %137, %125 : vector<8x64xf32>
    %148 = arith.addf %146, %147 : vector<8x64xf32>
    %149 = vector.extract_strided_slice %5 {offsets = [48, 0], sizes = [8, 192], strides = [1, 1]} : vector<64x192xf32> to vector<8x192xf32>
    %cst_29 = arith.constant dense<0.000000e+00> : vector<8x192xf32>
    %150 = tpu.matmul %148, %6, %cst_29 {dimension_numbers = #tpu.dot_dimension_numbers<[1], [0], [0], [1], [0, 0, 1, 1], [], []>} : vector<8x64xf32>, vector<64x192xf32>, vector<8x192xf32> -> vector<8x192xf32>
    %151 = vector.extract_strided_slice %149 {offsets = [0, 0], sizes = [8, 128], strides = [1, 1]} : vector<8x192xf32> to vector<8x128xf32>
    %152 = vector.extract_strided_slice %150 {offsets = [0, 0], sizes = [8, 128], strides = [1, 1]} : vector<8x192xf32> to vector<8x128xf32>
    %153 = arith.addf %151, %152 : vector<8x128xf32>
    %154 = arith.negf %153 : vector<8x128xf32>
    %155 = math.exp %154 : vector<8x128xf32>
    %cst_30 = arith.constant 1.000000e+00 : f32
    %156 = vector.broadcast %cst_30 : f32 to vector<8x128xf32>
    %157 = arith.addf %156, %155 : vector<8x128xf32>
    %158 = arith.divf %156, %157 : vector<8x128xf32>
    %159 = vector.extract_strided_slice %158 {offsets = [0, 0], sizes = [8, 64], strides = [1, 1]} : vector<8x128xf32> to vector<8x64xf32>
    %160 = vector.extract_strided_slice %158 {offsets = [0, 64], sizes = [8, 64], strides = [1, 1]} : vector<8x128xf32> to vector<8x64xf32>
    %161 = vector.extract_strided_slice %149 {offsets = [0, 128], sizes = [8, 64], strides = [1, 1]} : vector<8x192xf32> to vector<8x64xf32>
    %162 = vector.extract_strided_slice %150 {offsets = [0, 128], sizes = [8, 64], strides = [1, 1]} : vector<8x192xf32> to vector<8x64xf32>
    %163 = arith.addf %162, %9 : vector<8x64xf32>
    %164 = arith.mulf %159, %163 : vector<8x64xf32>
    %165 = arith.addf %161, %164 : vector<8x64xf32>
    %166 = math.tanh %165 : vector<8x64xf32>
    %cst_31 = arith.constant 1.000000e+00 : f32
    %167 = vector.broadcast %cst_31 : f32 to vector<8x64xf32>
    %168 = arith.subf %167, %160 : vector<8x64xf32>
    %169 = arith.mulf %168, %166 : vector<8x64xf32>
    %170 = arith.mulf %160, %148 : vector<8x64xf32>
    %171 = arith.addf %169, %170 : vector<8x64xf32>
    %172 = vector.extract_strided_slice %5 {offsets = [56, 0], sizes = [8, 192], strides = [1, 1]} : vector<64x192xf32> to vector<8x192xf32>
    %cst_32 = arith.constant dense<0.000000e+00> : vector<8x192xf32>
    %173 = tpu.matmul %171, %6, %cst_32 {dimension_numbers = #tpu.dot_dimension_numbers<[1], [0], [0], [1], [0, 0, 1, 1], [], []>} : vector<8x64xf32>, vector<64x192xf32>, vector<8x192xf32> -> vector<8x192xf32>
    %174 = vector.extract_strided_slice %172 {offsets = [0, 0], sizes = [8, 128], strides = [1, 1]} : vector<8x192xf32> to vector<8x128xf32>
    %175 = vector.extract_strided_slice %173 {offsets = [0, 0], sizes = [8, 128], strides = [1, 1]} : vector<8x192xf32> to vector<8x128xf32>
    %176 = arith.addf %174, %175 : vector<8x128xf32>
    %177 = arith.negf %176 : vector<8x128xf32>
    %178 = math.exp %177 : vector<8x128xf32>
    %cst_33 = arith.constant 1.000000e+00 : f32
    %179 = vector.broadcast %cst_33 : f32 to vector<8x128xf32>
    %180 = arith.addf %179, %178 : vector<8x128xf32>
    %181 = arith.divf %179, %180 : vector<8x128xf32>
    %182 = vector.extract_strided_slice %181 {offsets = [0, 0], sizes = [8, 64], strides = [1, 1]} : vector<8x128xf32> to vector<8x64xf32>
    %183 = vector.extract_strided_slice %181 {offsets = [0, 64], sizes = [8, 64], strides = [1, 1]} : vector<8x128xf32> to vector<8x64xf32>
    %184 = vector.extract_strided_slice %172 {offsets = [0, 128], sizes = [8, 64], strides = [1, 1]} : vector<8x192xf32> to vector<8x64xf32>
    %185 = vector.extract_strided_slice %173 {offsets = [0, 128], sizes = [8, 64], strides = [1, 1]} : vector<8x192xf32> to vector<8x64xf32>
    %186 = arith.addf %185, %9 : vector<8x64xf32>
    %187 = arith.mulf %182, %186 : vector<8x64xf32>
    %188 = arith.addf %184, %187 : vector<8x64xf32>
    %189 = math.tanh %188 : vector<8x64xf32>
    %cst_34 = arith.constant 1.000000e+00 : f32
    %190 = vector.broadcast %cst_34 : f32 to vector<8x64xf32>
    %191 = arith.subf %190, %183 : vector<8x64xf32>
    %192 = arith.mulf %191, %189 : vector<8x64xf32>
    %193 = arith.mulf %183, %171 : vector<8x64xf32>
    %194 = arith.addf %192, %193 : vector<8x64xf32>
    %195 = vector.extract_strided_slice %33 {offsets = [0, 0], sizes = [8, 32], strides = [1, 1]} : vector<8x64xf32> to vector<8x32xf32>
    %196 = vector.extract_strided_slice %56 {offsets = [0, 0], sizes = [8, 32], strides = [1, 1]} : vector<8x64xf32> to vector<8x32xf32>
    %197 = vector.extract_strided_slice %79 {offsets = [0, 0], sizes = [8, 32], strides = [1, 1]} : vector<8x64xf32> to vector<8x32xf32>
    %198 = vector.extract_strided_slice %102 {offsets = [0, 0], sizes = [8, 32], strides = [1, 1]} : vector<8x64xf32> to vector<8x32xf32>
    %199 = vector.extract_strided_slice %125 {offsets = [0, 0], sizes = [8, 32], strides = [1, 1]} : vector<8x64xf32> to vector<8x32xf32>
    %200 = vector.extract_strided_slice %148 {offsets = [0, 0], sizes = [8, 32], strides = [1, 1]} : vector<8x64xf32> to vector<8x32xf32>
    %201 = vector.extract_strided_slice %171 {offsets = [0, 0], sizes = [8, 32], strides = [1, 1]} : vector<8x64xf32> to vector<8x32xf32>
    %202 = vector.extract_strided_slice %194 {offsets = [0, 0], sizes = [8, 32], strides = [1, 1]} : vector<8x64xf32> to vector<8x32xf32>
    %203 = tpu.concatenate %195, %196, %197, %198, %199, %200, %201, %202 in 0 : vector<8x32xf32>, vector<8x32xf32>, vector<8x32xf32>, vector<8x32xf32>, vector<8x32xf32>, vector<8x32xf32>, vector<8x32xf32>, vector<8x32xf32> -> vector<64x32xf32>
    %204 = vector.extract_strided_slice %194 {offsets = [0, 32], sizes = [8, 32], strides = [1, 1]} : vector<8x64xf32> to vector<8x32xf32>
    %205 = vector.extract_strided_slice %171 {offsets = [0, 32], sizes = [8, 32], strides = [1, 1]} : vector<8x64xf32> to vector<8x32xf32>
    %206 = vector.extract_strided_slice %148 {offsets = [0, 32], sizes = [8, 32], strides = [1, 1]} : vector<8x64xf32> to vector<8x32xf32>
    %207 = vector.extract_strided_slice %125 {offsets = [0, 32], sizes = [8, 32], strides = [1, 1]} : vector<8x64xf32> to vector<8x32xf32>
    %208 = vector.extract_strided_slice %102 {offsets = [0, 32], sizes = [8, 32], strides = [1, 1]} : vector<8x64xf32> to vector<8x32xf32>
    %209 = vector.extract_strided_slice %79 {offsets = [0, 32], sizes = [8, 32], strides = [1, 1]} : vector<8x64xf32> to vector<8x32xf32>
    %210 = vector.extract_strided_slice %56 {offsets = [0, 32], sizes = [8, 32], strides = [1, 1]} : vector<8x64xf32> to vector<8x32xf32>
    %211 = vector.extract_strided_slice %33 {offsets = [0, 32], sizes = [8, 32], strides = [1, 1]} : vector<8x64xf32> to vector<8x32xf32>
    %212 = tpu.concatenate %204, %205, %206, %207, %208, %209, %210, %211 in 0 : vector<8x32xf32>, vector<8x32xf32>, vector<8x32xf32>, vector<8x32xf32>, vector<8x32xf32>, vector<8x32xf32>, vector<8x32xf32>, vector<8x32xf32> -> vector<64x32xf32>
    %c0_35 = arith.constant 0 : index
    %c0_36 = arith.constant 0 : index
    %213 = vector.load %arg4[%c0_35, %c0_36] : memref<32x4xf32, #tpu.memory_space<vmem>>, vector<32x4xf32>
    %cst_37 = arith.constant dense<0.000000e+00> : vector<64x4xf32>
    %214 = tpu.matmul %203, %213, %cst_37 {dimension_numbers = #tpu.dot_dimension_numbers<[1], [0], [0], [1], [0, 0, 1, 1], [], []>} : vector<64x32xf32>, vector<32x4xf32>, vector<64x4xf32> -> vector<64x4xf32>
    %c0_38 = arith.constant 0 : index
    %c0_39 = arith.constant 0 : index
    %215 = vector.load %arg5[%c0_38, %c0_39] : memref<32x4xf32, #tpu.memory_space<vmem>>, vector<32x4xf32>
    %cst_40 = arith.constant dense<0.000000e+00> : vector<64x4xf32>
    %216 = tpu.matmul %212, %215, %cst_40 {dimension_numbers = #tpu.dot_dimension_numbers<[1], [0], [0], [1], [0, 0, 1, 1], [], []>} : vector<64x32xf32>, vector<32x4xf32>, vector<64x4xf32> -> vector<64x4xf32>
    %217 = arith.addf %214, %216 : vector<64x4xf32>
    %c0_41 = arith.constant 0 : index
    %c0_42 = arith.constant 0 : index
    %218 = vector.load %arg8[%c0_41, %c0_42] : memref<1x4xf32, #tpu.memory_space<vmem>>, vector<1x4xf32>
    %219 = vector.broadcast %218 : vector<1x4xf32> to vector<64x4xf32>
    %220 = arith.addf %217, %219 : vector<64x4xf32>
    %c0_43 = arith.constant 0 : index
    %c0_44 = arith.constant 0 : index
    %221 = vector.load %arg9[%c0_43, %c0_44] : memref<64x4xf32, #tpu.memory_space<vmem>>, vector<64x4xf32>
    tpu.vector_store %arg9[%c0_43, %c0_44], %220 {strides = array<i32>} : memref<64x4xf32, #tpu.memory_space<vmem>>, vector<64x4xf32>,
    return
  }
}

</mosaic_0001>

<bundles_post_ra>
// kernel: tpu_custom_call.1
= control target key start
LH: loop header
LB: loop body
LE: loop exit
PB: predicated region body
PF: predicated region fallthrough
CT: control target
= control target key end

     0   :  { %14 = vsyncpa [#allocation3], 0  ;;  %s2134_s0 = inlined_call_operand.vmem [shape: f32[64,64], index: 0, kind: input, shape index: {}]   ;;  %s2135_s1 = inlined_call_operand.vmem [shape: f32[8,64], index: 1, kind: input, shape index: {}]   ;;  %s2136_s2 = inlined_call_operand.hbm [shape: f32[64,192], index: 2, kind: input, shape index: {}]   ;;  %s2137_s3 = inlined_call_operand.hbm [shape: f32[64,192], index: 3, kind: input, shape index: {}]   ;;  %s2138_s4 = inlined_call_operand.vmem [shape: f32[32,4], index: 4, kind: input, shape index: {}]   ;;  %s2139_s5 = inlined_call_operand.vmem [shape: f32[32,4], index: 5, kind: input, shape index: {}]   ;;  %s2140_s6 = inlined_call_operand.vmem [shape: f32[1,192], index: 6, kind: input, shape index: {}]   ;;  %s2141_s7 = inlined_call_operand.vmem [shape: f32[1,64], index: 7, kind: input, shape index: {}]   ;;  %s2142_s8 = inlined_call_operand.vmem [shape: f32[1,4], index: 8, kind: input, shape index: {}]   ;;  %s2143_s9 = inlined_call_operand.vmem [shape: f32[64,4], index: 9, kind: output, shape index: {}]  }
   0x1   :  { %15 = vsyncpa [#allocation5], 0  ;;  %s1704_s30 = smov [#allocation2]   ;;  %s1656_s13 = scalar_lea.hbm %s2136_s2, 2048 }
   0x2   :  { %s25_s10 = sshll.u32 %s1704_s30, 4  ;;  %p1657_p0 = scmp.ne.s32.totalorder %s2136_s2, %s1656_s13  ;;  %s26_s10 = int_to_ptr.vmem [resolvable:$true] %s25_s10 }
   0x3   :  { %p1660_p1 = scmp.lt.u32.totalorder %s1656_s13, %s2136_s2 }
   0x5   :  { %p1662_p2 = pnand %p1660_p1, %p1657_p0 }
   0x7   :  { %1665 = shalt.err (!%p1662_p2)
}
   0x8   :  { %s1666_s18 = scalar_lea.vmem %s26_s10, 2048  ;;  %p1671_p4 = scmp.lt.s32.totalorder %s26_s10, %s26_s10 }
   0x9   :  { %p1667_p3 = scmp.ne.s32.totalorder %s26_s10, %s1666_s18  ;;  %p1672_p5 = scmp.lt.s32.totalorder %s1666_s18, %s1666_s18 }
   0xb   :  { %p1673_p6 = por %p1672_p5, %p1671_p4 }
   0xd   :  { %p1674_p7 = pnand %p1673_p6, %p1667_p3 }
   0xf   :  { %1677 = shalt.err (!%p1674_p7)
}
  0x10   :  { %s1705_s19 = smov 256   ;;  %s1706_s20 = smov 16  }
  0x11   :  { %31 = dma.hbm_to_vmem [thread:$0]  %s2136_s2, 2048, %s26_s10, [#allocation3], %s1705_s19, %s1705_s19, %s1706_s20  }
  0x12   :  { %s1707_s23 = smov [#allocation4]   ;;  %s1678_s27 = scalar_lea.hbm %s2137_s3, 2048 }
  0x13   :  { %s37_s24 = sshll.u32 %s1707_s23, 4  ;;  %p1679_p8 = scmp.ne.s32.totalorder %s2137_s3, %s1678_s27  ;;  %s38_s24 = int_to_ptr.vmem [resolvable:$true] %s37_s24 }
  0x14   :  { %p1682_p9 = scmp.lt.u32.totalorder %s1678_s27, %s2137_s3 }
  0x16   :  { %p1684_p10 = pnand %p1682_p9, %p1679_p8 }
  0x18   :  { %1687 = shalt.err (!%p1684_p10)
}
  0x19   :  { %s1688_s12 = scalar_lea.vmem %s38_s24, 2048  ;;  %p1693_p12 = scmp.lt.s32.totalorder %s38_s24, %s38_s24 }
  0x1a   :  { %p1689_p11 = scmp.ne.s32.totalorder %s38_s24, %s1688_s12  ;;  %p1694_p13 = scmp.lt.s32.totalorder %s1688_s12, %s1688_s12 }
  0x1c   :  { %p1695_p0 = por %p1694_p13, %p1693_p12 }
  0x1e   :  { %p1696_p1 = pnand %p1695_p0, %p1689_p11 }
  0x20   :  { %1699 = shalt.err (!%p1696_p1)
}
  0x21   :  { %43 = dma.hbm_to_vmem [thread:$0]  %s2137_s3, 2048, %s38_s24, [#allocation5], %s1705_s19, %s1705_s19, %s1706_s20  }
  0x22   :  { %1700 = dma.done.wait [#allocation3], 2048  }
  0x23   :  { %1701 = vsyncadd [#allocation3], 4294965248 }
  0x24   :  { %1702 = dma.done.wait [#allocation5], 2048  }
  0x25   :  { %1703 = vsyncadd [#allocation5], 4294965248  ;;  %v1708_v0 = vmov 0.0   ;;  %v69_v1 = vld [vmem:[#allocation2 + $0x8] sm:$0xff]  ;;  %v71_v2 = vld [vmem:[#allocation2 + $0x18] sm:$0xff]  ;;  %vm96_vm0 = vcmask 523264   ;;  %v86_v55 = vlaneseq }
  0x26   :  { %209 = vmatprep.mubr.f32.mxu1 %v1708_v0  ;;  %185 = vmatprep.mubr.f32.mxu0 %v1708_v0  ;;  %v68_v3 = vld [vmem:[#allocation2] sm:$0xff]  ;;  %v1425_v4 = vpack.c.bf16 %v71_v2, %v69_v1  ;;  %v70_v5 = vld [vmem:[#allocation2 + $0x10] sm:$0xff]  ;;  %v73_v6 = vld [vmem:[#allocation2 + $0x28] sm:$0xff]  ;;  %vm1044_vm1 = vcmask 261120   ;;  %vm1304_vm2 = vcmask 31744  }
  0x27   :  { %v75_v7 = vld [vmem:[#allocation2 + $0x38] sm:$0xff]  ;;  %v1427_v8 = vpack.c.bf16 %v70_v5, %v68_v3  ;;  %v72_v10 = vld [vmem:[#allocation2 + $0x20] sm:$0xff]  ;;  %v74_v11 = vld [vmem:[#allocation2 + $0x30] sm:$0xff]  ;;  %v87_v60 = vshrl.u32 %v86_v55, 7 }
  0x28   :  { %v1429_v9 = vpack.c.bf16 %v75_v7, %v73_v6  ;;  %v77_v12 = vld [vmem:[#allocation2 + $0x48] sm:$0xff]  ;;  %1585 = vmatprep.subr.bf16.mxu1 %v1425_v4  ;;  %v79_v13 = vld [vmem:[#allocation2 + $0x58] sm:$0xff]  ;;  %1426 = vmatprep.subr.bf16.mxu0 %v1425_v4  ;;  %v1431_v14 = vpack.c.bf16 %v74_v11, %v72_v10  ;;  %v76_v16 = vld [vmem:[#allocation2 + $0x40] sm:$0xff] }
  0x29   :  { %1589 = vmatpush1.bf16.msra.mxu1 %v1427_v8  ;;  %1428 = vmatpush1.bf16.msra.mxu0 %v1427_v8  ;;  %v1433_v15 = vpack.c.bf16 %v79_v13, %v77_v12  ;;  %v78_v17 = vld [vmem:[#allocation2 + $0x50] sm:$0xff]  ;;  %v81_v18 = vld [vmem:[#allocation2 + $0x68] sm:$0xff]  ;;  %v83_v19 = vld [vmem:[#allocation2 + $0x78] sm:$0xff]  ;;  %v88_v63 = vsub.s32 0, %v87_v60 }
  0x2a   :  { %1586 = vmatprep.subr.bf16.mxu1 %v1429_v9  ;;  %1430 = vmatprep.subr.bf16.mxu0 %v1429_v9  ;;  %v1435_v20 = vpack.c.bf16 %v78_v17, %v76_v16  ;;  %v1437_v21 = vpack.c.bf16 %v83_v19, %v81_v18  ;;  %v80_v22 = vld [vmem:[#allocation2 + $0x60] sm:$0xff]  ;;  %v82_v23 = vld [vmem:[#allocation2 + $0x70] sm:$0xff]  ;;  %v235_v24 = vld [vmem:[#allocation4 + $0x8] sm:$0xff] }
  0x2b   :  { %v237_v25 = vld [vmem:[#allocation4 + $0x18] sm:$0xff]  ;;  %v1439_v26 = vpack.c.bf16 %v82_v23, %v80_v22  ;;  %v234_v28 = vld [vmem:[#allocation4] sm:$0xff]  ;;  %v236_v29 = vld [vmem:[#allocation4 + $0x10] sm:$0xff] }
  0x2c   :  { %v1787_v27 = vpack.c.bf16 %v237_v25, %v235_v24  ;;  %v239_v30 = vld [vmem:[#allocation4 + $0x28] sm:$0xff]  ;;  %v241_v31 = vld [vmem:[#allocation4 + $0x38] sm:$0xff]  ;;  %v64_v32 = vld [vmem:[%s2134_s0 + $0x20] sm:$0xff]  ;;  %v1792_v33 = vpack.c.bf16 %v236_v29, %v234_v28 }
  0x2d   :  { %1590 = vmatpush1.bf16.msra.mxu1 %v1431_v14  ;;  %1432 = vmatpush1.bf16.msra.mxu0 %v1431_v14  ;;  %v60_v34 = vld [vmem:[%s2134_s0] sm:$0xff]  ;;  %v1798_v35 = vpack.c.bf16 %v241_v31, %v239_v30  ;;  %v240_v37 = vld [vmem:[#allocation4 + $0x30] sm:$0xff]  ;;  %v243_v38 = vld [vmem:[#allocation4 + $0x48] sm:$0xff]  ;;  %v92_v14 = vsub.s32 1, %v87_v60 }
  0x2e   :  { %1587 = vmatprep.subr.bf16.mxu1 %v1433_v15  ;;  %1434 = vmatprep.subr.bf16.mxu0 %v1433_v15  ;;  %v238_v36 = vld [vmem:[#allocation4 + $0x20] sm:$0xff]  ;;  %v245_v39 = vld [vmem:[#allocation4 + $0x58] sm:$0xff]  ;;  %v65_v40 = vld [vmem:[%s2134_s0 + $0x28] sm:$0xff] }
  0x2f   :  { %v1808_v41 = vpack.c.bf16 %v240_v37, %v238_v36  ;;  %v1811_v42 = vpack.c.bf16 %v245_v39, %v243_v38  ;;  %v242_v43 = vld [vmem:[#allocation4 + $0x40] sm:$0xff]  ;;  %v244_v44 = vld [vmem:[#allocation4 + $0x50] sm:$0xff]  ;;  %v247_v45 = vld [vmem:[#allocation4 + $0x68] sm:$0xff] }
  0x30   :  { %v249_v46 = vld [vmem:[#allocation4 + $0x78] sm:$0xff]  ;;  %v66_v47 = vld [vmem:[%s2134_s0 + $0x30] sm:$0xff]  ;;  %v1822_v48 = vpack.c.bf16 %v244_v44, %v242_v43  ;;  %v246_v50 = vld [vmem:[#allocation4 + $0x60] sm:$0xff] }
  0x31   :  { %1591 = vmatpush1.bf16.msra.mxu1 %v1435_v20  ;;  %1436 = vmatpush1.bf16.msra.mxu0 %v1435_v20  ;;  %v1825_v49 = vpack.c.bf16 %v249_v46, %v247_v45  ;;  %v248_v51 = vld [vmem:[#allocation4 + $0x70] sm:$0xff]  ;;  %v67_v52 = vld [vmem:[%s2134_s0 + $0x38] sm:$0xff]  ;;  %v257_v54 = vld [vmem:[%s2135_s1] sm:$0xff] }
  0x32   :  { %1588 = vmatprep.subr.bf16.mxu1 %v1437_v21  ;;  %1438 = vmatprep.subr.bf16.mxu0 %v1437_v21  ;;  %v1835_v53 = vpack.c.bf16 %v248_v51, %v246_v50  ;;  %v84_v1 = vld [vmem:[%s2140_s6] sm:$0x3]  ;;  %v61_v22 = vld [vmem:[%s2134_s0 + $0x8] sm:$0xff] }
  0x33   :  { %v1874_v4 = vrot.slane %v84_v1, %v88_v63  ;;  %v1884_v15 = vld [vmem:[%s2141_s7] ss:$0 sm:$0xff]  ;;  %v1886_v16 = vrot.slane %v84_v1, %v92_v14  ;;  %s1709_s7 = smov 64  }
  0x35   :  { %1592 = vmatpush1.bf16.msra.mxu1 %v1439_v26  ;;  %1440 = vmatpush1.bf16.msra.mxu0 %v1439_v26 }
  0x36   :  { %1442 = vmatprep.subr.bf16.mxu1 %v1787_v27  ;;  %1474 = vmatprep.subr.bf16.mxu0 %v1787_v27 }
  0x38   :  { %1323 = vmatmul.mubr.msk.f32.vlgmr.msra.gmra.mrb[0].mxu1 %vm96_vm0, %v64_v32  ;;  %1319 = vmatmul.mubr.msk.f32.vlgmr.msra.gmra.mrb[0].mxu0 %vm96_vm0, %v60_v34 }
  0x39   :  { %1444 = vmatpush1.bf16.msra.mxu1 %v1792_v33  ;;  %215 = vmatprep.mubr.f32.mxu1 %v1708_v0 }
  0x3a   :  { %1446 = vmatprep.subr.bf16.mxu1 %v1798_v35  ;;  %191 = vmatprep.mubr.f32.mxu0 %v1708_v0 }
  0x3b   :  { %1476 = vmatpush1.bf16.msra.mxu0 %v1792_v33 }
  0x3c   :  { %1324 = vmatmul.mubr.msk.f32.gmra.mrb[2].mxu1 %vm96_vm0, %v65_v40  ;;  %1478 = vmatprep.subr.bf16.mxu0 %v1798_v35 }
  0x3d   :  { %1448 = vmatpush1.bf16.msra.mxu1 %v1808_v41  ;;  %221 = vmatprep.mubr.f32.mxu1 %v1708_v0 }
  0x3e   :  { %1450 = vmatprep.subr.bf16.mxu1 %v1811_v42  ;;  %1320 = vmatmul.mubr.msk.f32.gmra.mrb[2].mxu0 %vm96_vm0, %v61_v22 }
  0x3f   :  { %1480 = vmatpush1.bf16.msra.mxu0 %v1808_v41  ;;  %197 = vmatprep.mubr.f32.mxu0 %v1708_v0 }
  0x40   :  { %1325 = vmatmul.mubr.msk.f32.gmra.mrb[4].mxu1 %vm96_vm0, %v66_v47  ;;  %1482 = vmatprep.subr.bf16.mxu0 %v1811_v42 }
  0x41   :  { %1452 = vmatpush1.bf16.msra.mxu1 %v1822_v48  ;;  %227 = vmatprep.mubr.f32.mxu1 %v1708_v0 }
  0x42   :  { %1454 = vmatprep.subr.bf16.mxu1 %v1825_v49 }
  0x43   :  { %1484 = vmatpush1.bf16.msra.mxu0 %v1822_v48 }
  0x44   :  { %1326 = vmatmul.mubr.msk.f32.gmra.mrb[6].mxu1 %vm96_vm0, %v67_v52  ;;  %1486 = vmatprep.subr.bf16.mxu0 %v1825_v49  ;;  %v62_v52 = vld [vmem:[%s2134_s0 + $0x10] sm:$0xff] }
  0x45   :  { %1456 = vmatpush1.bf16.msra.mxu1 %v1835_v53  ;;  %325 = vmatprep.mubr.f32.mxu1 %v1708_v0 }
  0x46   :  { %1458 = vmatprep.subr.bf16.mxu1 %v1787_v27  ;;  %1321 = vmatmul.mubr.msk.f32.gmra.mrb[4].mxu0 %vm96_vm0, %v62_v52 }
  0x47   :  { %1488 = vmatpush1.bf16.msra.mxu0 %v1835_v53  ;;  %203 = vmatprep.mubr.f32.mxu0 %v1708_v0 }
  0x48   :  { %1328 = vmatmul.mubr.msk.f32.vlgmr.msra.gmra.mrb[8].mxu1 %vm96_vm0, %v257_v54  ;;  %1506 = vmatprep.subr.bf16.mxu0 %v1787_v27 }
  0x49   :  { %1460 = vmatpush1.bf16.msra.mxu1 %v1792_v33  ;;  %423 = vmatprep.mubr.f32.mxu1 %v1708_v0 }
  0x4a   :  { %1462 = vmatprep.subr.bf16.mxu1 %v1798_v35 }
  0x4d   :  { %1464 = vmatpush1.bf16.msra.mxu1 %v1808_v41 }
  0x4e   :  { %1466 = vmatprep.subr.bf16.mxu1 %v1811_v42 }
  0x51   :  { %1468 = vmatpush1.bf16.msra.mxu1 %v1822_v48 }
  0x52   :  { %1470 = vmatprep.subr.bf16.mxu1 %v1825_v49 }
  0x55   :  { %1472 = vmatpush1.bf16.msra.mxu1 %v1835_v53 }
  0x56   :  { %1490 = vmatprep.subr.bf16.mxu1 %v1787_v27 }
 0x10b   :  { %v1859_v56 = vpop.f32.mrb[0].mxu1  ;;  %v187_v57 = vpop.f32.mrb[0].mxu0 }
 0x10c   :  { %v1861_v58 = vpop.f32.mrb[1].mxu1  ;;  %v189_v59 = vpop.f32.mrb[1].mxu0  ;;  %v188_v7 = vadd.f32 %v187_v57, %v1874_v4 }
 0x10d   :  { %v190_v19 = vadd.f32 %v189_v59, %v1886_v16 }
 0x10f   :  { %v1863_v61 = vpop.f32.mrb[2].mxu1 }
 0x110   :  { %v1865_v62 = vpop.f32.mrb[3].mxu1 }
 0x111   :  { %v193_v31 = vpop.f32.mrb[2].mxu0 }
 0x112   :  { %v195_v32 = vpop.f32.mrb[3].mxu0  ;;  %v194_v36 = vadd.f32 %v193_v31, %v1874_v4 }
 0x113   :  { %v1870_v2 = vpop.f32.mrb[4].mxu1  ;;  %v196_v47 = vadd.f32 %v195_v32, %v1886_v16 }
 0x114   :  { %v1872_v3 = vpop.f32.mrb[5].mxu1 }
 0x117   :  { %v1876_v5 = vpop.f32.mrb[6].mxu1 }
 0x118   :  { %v1878_v6 = vpop.f32.mrb[7].mxu1 }
 0x11b   :  { %v327_v8 = vpop.f32.mrb[8].mxu1 }
 0x11c   :  { %v332_v9 = vadd.f32 %v327_v8, %v188_v7  ;;  %v329_v10 = vpop.f32.mrb[9].mxu1  ;;  %v199_v7 = vpop.f32.mrb[4].mxu0 }
 0x11d   :  { %v339_v17 = vadd.f32 %v1884_v15, %v329_v10  ;;  %v201_v8 = vpop.f32.mrb[5].mxu0 }
 0x11e   :  { %v1329_v11 = vmul.f32 -1.442695, %v332_v9 }
 0x120   :  { %1608 = vpow2.f32 %v1329_v11 }
 0x12a   :  { %v1609_v12 = vpop.eup %1608 }
 0x12b   :  { %v336_v13 = vadd.f32 1.0, %v1609_v12  ;;  %v200_v12 = vadd.f32 %v199_v7, %v1874_v4 }
 0x12d   :  { %1610 = vrcp.f32 %v336_v13 }
 0x137   :  { %v1611_v18 = vpop.eup %1610 }
 0x138   :  { %v340_v20 = vmul.f32 %v1611_v18, %v339_v17  ;;  %v343_v25 = vsub.f32 1.0, %v1611_v18 }
 0x13a   :  { %v341_v21 = vadd.f32 %v340_v20, %v190_v19 }
 0x13c   :  { %1612 = vtanh.f32 %v341_v21 }
 0x146   :  { %v1613_v23 = vpop.eup %1612 }
 0x147   :  { %345 = vrot.lane.b32.xlu0 %v1613_v23, %s1709_s7  ;;  %v202_v23 = vadd.f32 %v201_v8, %v1886_v16  ;;  %v212_v8 = vadd.f32 %v1859_v56, %v1874_v4 }
 0x14b   :  { %349 = vrot.lane.b32.xlu0 %v257_v54, %s1709_s7  ;;  %v63_v54 = vld [vmem:[%s2134_s0 + $0x18] sm:$0xff]  ;;  %s1710_s0 = smov 32  }
 0x14c   :  { %1322 = vmatmul.mubr.msk.f32.gmra.mrb[6].mxu0 %vm96_vm0, %v63_v54 }
 0x14d   :  { %518 = vmatprep.mubr.f32.mxu0 %v1708_v0 }
 0x1b9   :  { %v346_v24 = vpop.permute.xlu0 %345 }
 0x1ba   :  { %v348_v28 = vmul.f32 %v346_v24, %v343_v25 }
 0x1bd   :  { %v350_v26 = vpop.permute.xlu0 %349 }
 0x1be   :  { %v352_v29 = vmul.f32 %v1611_v18, %v350_v26 }
 0x1c0   :  { %v1897_v30 = vadd.f32 %v352_v29, %v348_v28 }
 0x1c2   :  { %355 = vrot.lane.b32.xlu1 %v1897_v30, %s1709_s7 }
 0x21f   :  { %v205_v9 = vpop.f32.mrb[6].mxu0 }
 0x220   :  { %v207_v10 = vpop.f32.mrb[7].mxu0 }
 0x234   :  { %v1901_v34 = vpop.permute.xlu1 %355 }
 0x235   :  { %1330 = vmatmul.mubr.msk.f32.vlgmr.msra.gmra.mrb[10].mxu1 %vm96_vm0, %v1901_v34 }
 0x236   :  { %1492 = vmatpush1.bf16.msra.mxu1 %v1792_v33  ;;  %613 = vmatprep.mubr.f32.mxu1 %v1708_v0 }
 0x237   :  { %1494 = vmatprep.subr.bf16.mxu1 %v1798_v35 }
 0x23a   :  { %1496 = vmatpush1.bf16.msra.mxu1 %v1808_v41 }
 0x23b   :  { %1498 = vmatprep.subr.bf16.mxu1 %v1811_v42 }
 0x23e   :  { %1500 = vmatpush1.bf16.msra.mxu1 %v1822_v48 }
 0x23f   :  { %1502 = vmatprep.subr.bf16.mxu1 %v1825_v49 }
 0x242   :  { %1504 = vmatpush1.bf16.msra.mxu1 %v1835_v53 }
 0x243   :  { %1522 = vmatprep.subr.bf16.mxu1 %v1787_v27 }
 0x308   :  { %v425_v37 = vpop.f32.mrb[10].mxu1 }
 0x309   :  { %v430_v38 = vadd.f32 %v425_v37, %v194_v36  ;;  %v427_v39 = vpop.f32.mrb[11].mxu1 }
 0x30a   :  { %v437_v45 = vadd.f32 %v1884_v15, %v427_v39 }
 0x30b   :  { %v1331_v40 = vmul.f32 -1.442695, %v430_v38  ;;  %v206_v38 = vadd.f32 %v205_v9, %v1874_v4 }
 0x30d   :  { %1614 = vpow2.f32 %v1331_v40 }
 0x317   :  { %v1615_v43 = vpop.eup %1614 }
 0x318   :  { %v434_v44 = vadd.f32 1.0, %v1615_v43 }
 0x31a   :  { %1616 = vrcp.f32 %v434_v44 }
 0x324   :  { %v1617_v46 = vpop.eup %1616 }
 0x325   :  { %v438_v50 = vmul.f32 %v1617_v46, %v437_v45  ;;  %v441_v57 = vsub.f32 1.0, %v1617_v46  ;;  %v447_v60 = vmul.f32 %v1617_v46, %v1897_v30 }
 0x327   :  { %v439_v51 = vadd.f32 %v438_v50, %v196_v47 }
 0x329   :  { %1618 = vtanh.f32 %v439_v51  ;;  %v208_v51 = vadd.f32 %v207_v10, %v1886_v16 }
 0x333   :  { %v1619_v55 = vpop.eup %1618 }
 0x334   :  { %443 = vrot.lane.b32.xlu1 %v1619_v55, %s1709_s7 }
 0x3a6   :  { %v444_v59 = vpop.permute.xlu1 %443 }
 0x3a7   :  { %v446_v63 = vmul.f32 %v444_v59, %v441_v57 }
 0x3a9   :  { %v1929_v1 = vadd.f32 %v447_v60, %v446_v63 }
 0x3ab   :  { %450 = vrot.lane.b32.xlu0 %v1929_v1, %s1709_s7 }
 0x41d   :  { %v1933_v11 = vpop.permute.xlu0 %450 }
 0x41e   :  { %1332 = vmatmul.mubr.msk.f32.vlgmr.msra.gmra.mrb[8].mxu0 %vm96_vm0, %v1933_v11 }
 0x41f   :  { %1508 = vmatpush1.bf16.msra.mxu0 %v1792_v33  ;;  %708 = vmatprep.mubr.f32.mxu0 %v1708_v0 }
 0x420   :  { %1510 = vmatprep.subr.bf16.mxu0 %v1798_v35 }
 0x423   :  { %1512 = vmatpush1.bf16.msra.mxu0 %v1808_v41 }
 0x424   :  { %1514 = vmatprep.subr.bf16.mxu0 %v1811_v42 }
 0x427   :  { %1516 = vmatpush1.bf16.msra.mxu0 %v1822_v48 }
 0x428   :  { %1518 = vmatprep.subr.bf16.mxu0 %v1825_v49 }
 0x42b   :  { %1520 = vmatpush1.bf16.msra.mxu0 %v1835_v53 }
 0x42c   :  { %1538 = vmatprep.subr.bf16.mxu0 %v1787_v27 }
 0x4f1   :  { %v520_v13 = vpop.f32.mrb[8].mxu0 }
 0x4f2   :  { %v525_v14 = vadd.f32 %v520_v13, %v200_v12  ;;  %v522_v17 = vpop.f32.mrb[9].mxu0 }
 0x4f3   :  { %v532_v21 = vadd.f32 %v1884_v15, %v522_v17 }
 0x4f4   :  { %v1333_v18 = vmul.f32 -1.442695, %v525_v14 }
 0x4f6   :  { %1620 = vpow2.f32 %v1333_v18 }
 0x500   :  { %v1621_v19 = vpop.eup %1620 }
 0x501   :  { %v529_v20 = vadd.f32 1.0, %v1621_v19 }
 0x503   :  { %1622 = vrcp.f32 %v529_v20  ;;  %v214_v20 = vadd.f32 %v1861_v58, %v1886_v16  ;;  %v218_v58 = vadd.f32 %v1863_v61, %v1874_v4 }
 0x50d   :  { %v1623_v22 = vpop.eup %1622 }
 0x50e   :  { %v533_v24 = vmul.f32 %v1623_v22, %v532_v21  ;;  %v536_v28 = vsub.f32 1.0, %v1623_v22  ;;  %v542_v31 = vmul.f32 %v1623_v22, %v1929_v1 }
 0x510   :  { %v534_v25 = vadd.f32 %v533_v24, %v202_v23 }
 0x512   :  { %1624 = vtanh.f32 %v534_v25 }
 0x51c   :  { %v1625_v26 = vpop.eup %1624 }
 0x51d   :  { %538 = vrot.lane.b32.xlu1 %v1625_v26, %s1709_s7 }
 0x58f   :  { %v539_v29 = vpop.permute.xlu1 %538 }
 0x590   :  { %v541_v32 = vmul.f32 %v539_v29, %v536_v28 }
 0x592   :  { %v1951_v36 = vadd.f32 %v542_v31, %v541_v32 }
 0x594   :  { %545 = vrot.lane.b32.xlu0 %v1951_v36, %s1709_s7 }
 0x606   :  { %v1955_v37 = vpop.permute.xlu0 %545 }
 0x607   :  { %1334 = vmatmul.mubr.msk.f32.vlgmr.msra.gmra.mrb[12].mxu1 %vm96_vm0, %v1955_v37 }
 0x608   :  { %1524 = vmatpush1.bf16.msra.mxu1 %v1792_v33  ;;  %803 = vmatprep.mubr.f32.mxu1 %v1708_v0 }
 0x609   :  { %1526 = vmatprep.subr.bf16.mxu1 %v1798_v35 }
 0x60c   :  { %1528 = vmatpush1.bf16.msra.mxu1 %v1808_v41 }
 0x60d   :  { %1530 = vmatprep.subr.bf16.mxu1 %v1811_v42 }
 0x610   :  { %1532 = vmatpush1.bf16.msra.mxu1 %v1822_v48 }
 0x611   :  { %1534 = vmatprep.subr.bf16.mxu1 %v1825_v49 }
 0x614   :  { %1536 = vmatpush1.bf16.msra.mxu1 %v1835_v53 }
 0x615   :  { %1554 = vmatprep.subr.bf16.mxu1 %v1787_v27 }
 0x6da   :  { %v615_v39 = vpop.f32.mrb[12].mxu1 }
 0x6db   :  { %v620_v40 = vadd.f32 %v615_v39, %v206_v38  ;;  %v617_v43 = vpop.f32.mrb[13].mxu1 }
 0x6dc   :  { %v627_v47 = vadd.f32 %v1884_v15, %v617_v43 }
 0x6dd   :  { %v1335_v44 = vmul.f32 -1.442695, %v620_v40 }
 0x6df   :  { %1626 = vpow2.f32 %v1335_v44 }
 0x6e9   :  { %v1627_v45 = vpop.eup %1626 }
 0x6ea   :  { %v624_v46 = vadd.f32 1.0, %v1627_v45 }
 0x6ec   :  { %1628 = vrcp.f32 %v624_v46 }
 0x6f6   :  { %v1629_v50 = vpop.eup %1628 }
 0x6f7   :  { %v628_v52 = vmul.f32 %v1629_v50, %v627_v47  ;;  %v631_v27 = vsub.f32 1.0, %v1629_v50  ;;  %v637_v59 = vmul.f32 %v1629_v50, %v1951_v36 }
 0x6f9   :  { %v629_v54 = vadd.f32 %v628_v52, %v208_v51 }
 0x6fb   :  { %1630 = vtanh.f32 %v629_v54 }
 0x705   :  { %v1631_v55 = vpop.eup %1630 }
 0x706   :  { %633 = vrot.lane.b32.xlu1 %v1631_v55, %s1709_s7 }
 0x778   :  { %v634_v57 = vpop.permute.xlu1 %633 }
 0x779   :  { %v636_v60 = vmul.f32 %v634_v57, %v631_v27 }
 0x77b   :  { %v1973_v63 = vadd.f32 %v637_v59, %v636_v60  ;;  %v226_v59 = vadd.f32 %v1872_v3, %v1886_v16  ;;  %v230_v3 = vadd.f32 %v1876_v5, %v1874_v4  ;;  %v1024_v5 = vld [vmem:[%s2139_s5 + $0x8] sm:$0xff] }
 0x77d   :  { %640 = vrot.lane.b32.xlu0 %v1973_v63, %s1709_s7 }
 0x7ef   :  { %v1977_v7 = vpop.permute.xlu0 %640 }
 0x7f0   :  { %1336 = vmatmul.mubr.msk.f32.vlgmr.msra.gmra.mrb[10].mxu0 %vm96_vm0, %v1977_v7 }
 0x7f1   :  { %1540 = vmatpush1.bf16.msra.mxu0 %v1792_v33  ;;  %898 = vmatprep.mubr.f32.mxu0 %v1708_v0 }
 0x7f2   :  { %1542 = vmatprep.subr.bf16.mxu0 %v1798_v35 }
 0x7f5   :  { %1544 = vmatpush1.bf16.msra.mxu0 %v1808_v41 }
 0x7f6   :  { %1546 = vmatprep.subr.bf16.mxu0 %v1811_v42 }
 0x7f9   :  { %1548 = vmatpush1.bf16.msra.mxu0 %v1822_v48 }
 0x7fa   :  { %1550 = vmatprep.subr.bf16.mxu0 %v1825_v49 }
 0x7fd   :  { %1552 = vmatpush1.bf16.msra.mxu0 %v1835_v53 }
 0x8c3   :  { %v710_v9 = vpop.f32.mrb[10].mxu0 }
 0x8c4   :  { %v715_v10 = vadd.f32 %v710_v9, %v212_v8  ;;  %v712_v12 = vpop.f32.mrb[11].mxu0 }
 0x8c5   :  { %v722_v18 = vadd.f32 %v1884_v15, %v712_v12 }
 0x8c6   :  { %v1337_v13 = vmul.f32 -1.442695, %v715_v10 }
 0x8c8   :  { %1632 = vpow2.f32 %v1337_v13 }
 0x8d2   :  { %v1633_v14 = vpop.eup %1632 }
 0x8d3   :  { %v719_v17 = vadd.f32 1.0, %v1633_v14 }
 0x8d5   :  { %1634 = vrcp.f32 %v719_v17 }
 0x8df   :  { %v1635_v19 = vpop.eup %1634 }
 0x8e0   :  { %v723_v21 = vmul.f32 %v1635_v19, %v722_v18  ;;  %v726_v56 = vsub.f32 1.0, %v1635_v19  ;;  %v732_v25 = vmul.f32 %v1635_v19, %v1973_v63 }
 0x8e2   :  { %v724_v22 = vadd.f32 %v723_v21, %v214_v20 }
 0x8e4   :  { %1636 = vtanh.f32 %v724_v22 }
 0x8ee   :  { %v1637_v23 = vpop.eup %1636 }
 0x8ef   :  { %728 = vrot.lane.b32.xlu1 %v1637_v23, %s1709_s7 }
 0x961   :  { %v729_v24 = vpop.permute.xlu1 %728 }
 0x962   :  { %v731_v26 = vmul.f32 %v729_v24, %v726_v56 }
 0x964   :  { %v1996_v28 = vadd.f32 %v732_v25, %v731_v26  ;;  %v232_v25 = vadd.f32 %v1878_v6, %v1886_v16  ;;  %v1025_v6 = vld [vmem:[%s2139_s5 + $0x10] sm:$0xff] }
 0x966   :  { %735 = vrot.lane.b32.xlu0 %v1996_v28, %s1709_s7 }
 0x9d8   :  { %v2000_v29 = vpop.permute.xlu0 %735 }
 0x9d9   :  { %1338 = vmatmul.mubr.msk.f32.vlgmr.msra.gmra.mrb[14].mxu1 %vm96_vm0, %v2000_v29 }
 0x9da   :  { %1556 = vmatpush1.bf16.msra.mxu1 %v1792_v33  ;;  %993 = vmatprep.mubr.f32.mxu1 %v1708_v0 }
 0x9db   :  { %1558 = vmatprep.subr.bf16.mxu1 %v1798_v35 }
 0x9de   :  { %1560 = vmatpush1.bf16.msra.mxu1 %v1808_v41 }
 0x9df   :  { %1562 = vmatprep.subr.bf16.mxu1 %v1811_v42 }
 0x9e2   :  { %1564 = vmatpush1.bf16.msra.mxu1 %v1822_v48  ;;  %v220_v48 = vadd.f32 %v1865_v62, %v1886_v16  ;;  %v224_v62 = vadd.f32 %v1870_v2, %v1874_v4  ;;  %v1023_v4 = vld [vmem:[%s2139_s5] sm:$0xff]  ;;  %v1026_v16 = vld [vmem:[%s2139_s5 + $0x18] sm:$0xff] }
 0x9e3   :  { %1566 = vmatprep.subr.bf16.mxu1 %v1825_v49 }
 0x9e6   :  { %1568 = vmatpush1.bf16.msra.mxu1 %v1835_v53 }
 0xaac   :  { %v805_v31 = vpop.f32.mrb[14].mxu1 }
 0xaad   :  { %v810_v32 = vadd.f32 %v805_v31, %v218_v58  ;;  %v807_v33 = vpop.f32.mrb[15].mxu1 }
 0xaae   :  { %v817_v41 = vadd.f32 %v1884_v15, %v807_v33  ;;  %v1019_v33 = vld [vmem:[%s2138_s4] sm:$0xff] }
 0xaaf   :  { %v1339_v38 = vmul.f32 -1.442695, %v810_v32  ;;  %v1573_v32 = vpack.c.bf16 %v1026_v16, %v1025_v6 }
 0xab1   :  { %1638 = vpow2.f32 %v1339_v38 }
 0xabb   :  { %v1639_v0 = vpop.eup %1638 }
 0xabc   :  { %v814_v35 = vadd.f32 1.0, %v1639_v0 }
 0xabe   :  { %1640 = vrcp.f32 %v814_v35 }
 0xac8   :  { %v1641_v42 = vpop.eup %1640 }
 0xac9   :  { %v818_v49 = vmul.f32 %v1641_v42, %v817_v41  ;;  %v821_v61 = vsub.f32 1.0, %v1641_v42  ;;  %v827_v43 = vmul.f32 %v1641_v42, %v1996_v28 }
 0xacb   :  { %v819_v39 = vadd.f32 %v818_v49, %v220_v48  ;;  %v1022_v49 = vld [vmem:[%s2138_s4 + $0x18] sm:$0xff] }
 0xacd   :  { %1642 = vtanh.f32 %v819_v39 }
 0xad7   :  { %v1643_v53 = vpop.eup %1642 }
 0xad8   :  { %823 = vrot.lane.b32.xlu1 %v1643_v53, %s1709_s7 }
 0xb4a   :  { %v824_v40 = vpop.permute.xlu1 %823 }
 0xb4b   :  { %v826_v44 = vmul.f32 %v824_v40, %v821_v61 }
 0xb4d   :  { %v2019_v45 = vadd.f32 %v827_v43, %v826_v44 }
 0xb4f   :  { %830 = vrot.lane.b32.xlu0 %v2019_v45, %s1709_s7 }
 0xbc1   :  { %v2023_v46 = vpop.permute.xlu0 %830 }
 0xbc2   :  { %1340 = vmatmul.mubr.msk.f32.vlgmr.msra.gmra.mrb[12].mxu0 %vm96_vm0, %v2023_v46 }
 0xc95   :  { %v900_v47 = vpop.f32.mrb[12].mxu0 }
 0xc96   :  { %v905_v50 = vadd.f32 %v900_v47, %v224_v62  ;;  %v902_v51 = vpop.f32.mrb[13].mxu0 }
 0xc97   :  { %v912_v27 = vadd.f32 %v1884_v15, %v902_v51 }
 0xc98   :  { %v1341_v52 = vmul.f32 -1.442695, %v905_v50 }
 0xc9a   :  { %1644 = vpow2.f32 %v1341_v52 }
 0xca4   :  { %v1645_v54 = vpop.eup %1644 }
 0xca5   :  { %v909_v55 = vadd.f32 1.0, %v1645_v54 }
 0xca7   :  { %1646 = vrcp.f32 %v909_v55 }
 0xcb1   :  { %v1647_v57 = vpop.eup %1646 }
 0xcb2   :  { %v913_v60 = vmul.f32 %v1647_v57, %v912_v27  ;;  %v916_v2 = vsub.f32 1.0, %v1647_v57  ;;  %v922_v12 = vmul.f32 %v1647_v57, %v2019_v45 }
 0xcb4   :  { %v914_v8 = vadd.f32 %v913_v60, %v226_v59 }
 0xcb6   :  { %1648 = vtanh.f32 %v914_v8 }
 0xcc0   :  { %v1649_v9 = vpop.eup %1648 }
 0xcc1   :  { %918 = vrot.lane.b32.xlu1 %v1649_v9, %s1709_s7 }
 0xd33   :  { %v919_v10 = vpop.permute.xlu1 %918 }
 0xd34   :  { %v921_v13 = vmul.f32 %v919_v10, %v916_v2 }
 0xd36   :  { %v923_v14 = vadd.f32 %v922_v12, %v921_v13 }
 0xd38   :  { %925 = vrot.lane.b32.xlu0 %v923_v14, %s1709_s7 }
 0xdaa   :  { %v2035_v17 = vpop.permute.xlu0 %925 }
 0xdab   :  { %1342 = vmatmul.mubr.msk.f32.vlgmr.msra.gmra.mrb[16].mxu1 %vm96_vm0, %v2035_v17 }
 0xe7e   :  { %v995_v18 = vpop.f32.mrb[16].mxu1 }
 0xe7f   :  { %v1000_v19 = vadd.f32 %v995_v18, %v230_v3  ;;  %v997_v20 = vpop.f32.mrb[17].mxu1 }
 0xe80   :  { %v1007_v56 = vadd.f32 %v1884_v15, %v997_v20  ;;  %v1569_v15 = vpack.c.bf16 %v1024_v5, %v1023_v4 }
 0xe81   :  { %v1343_v21 = vmul.f32 -1.442695, %v1000_v19 }
 0xe82   :  { %1570 = vmatprep.subr.bf16.mxu0 %v1569_v15 }
 0xe83   :  { %1650 = vpow2.f32 %v1343_v21  ;;  %1572 = vmatpush3.bf16.msra.mxu0 %v1569_v15 }
 0xe84   :  { %1574 = vmatprep.subr.bf16.mxu0 %v1573_v32 }
 0xe87   :  { %1576 = vmatpush3.bf16.msra.mxu0 %v1573_v32 }
 0xe8d   :  { %v1651_v22 = vpop.eup %1650 }
 0xe8e   :  { %v1004_v23 = vadd.f32 1.0, %v1651_v22 }
 0xe90   :  { %1652 = vrcp.f32 %v1004_v23 }
 0xe9a   :  { %v1653_v24 = vpop.eup %1652 }
 0xe9b   :  { %v1008_v26 = vmul.f32 %v1653_v24, %v1007_v56  ;;  %v1011_v0 = vsub.f32 1.0, %v1653_v24  ;;  %v1017_v41 = vmul.f32 %v1653_v24, %v923_v14 }
 0xe9d   :  { %v1009_v58 = vadd.f32 %v1008_v26, %v232_v25 }
 0xe9f   :  { %1654 = vtanh.f32 %v1009_v58 }
 0xea9   :  { %v1655_v31 = vpop.eup %1654 }
 0xeaa   :  { %1013 = vrot.lane.b32.xlu1 %v1655_v31, %s1709_s7 }
 0xeae   :  { %1030 = vrot.lane.b32.xlu1 %v923_v14, %s1710_s0 }
 0xeb2   :  { %1034 = vrot.lane.b32.xlu1 %v1996_v28, %s1710_s0  ;;  %v1020_v28 = vld [vmem:[%s2138_s4 + $0x8] sm:$0xff] }
 0xeb3   :  { %v1577_v38 = vpack.c.bf16 %v1020_v28, %v1019_v33 }
 0xeb5   :  { %1578 = vmatprep.subr.bf16.mxu0 %v1577_v38 }
 0xeb6   :  { %1038 = vrot.lane.b32.xlu1 %v1951_v36, %s1710_s0  ;;  %v1021_v36 = vld [vmem:[%s2138_s4 + $0x10] sm:$0xff] }
 0xeb7   :  { %v1581_v53 = vpack.c.bf16 %v1022_v49, %v1021_v36 }
 0xeba   :  { %1042 = vrot.lane.b32.xlu1 %v1897_v30, %s1710_s0 }
 0xf1c   :  { %v1014_v35 = vpop.permute.xlu1 %1013 }
 0xf1d   :  { %v1016_v42 = vmul.f32 %v1014_v35, %v1011_v0 }
 0xf1f   :  { %v1018_v48 = vadd.f32 %v1017_v41, %v1016_v42 }
 0xf20   :  { %v1031_v30 = vpop.permute.xlu1 %1030 }
 0xf21   :  { %1028 = vrot.lane.b32.xlu0 %v1018_v48, %s1710_s0 }
 0xf24   :  { %v1035_v61 = vpop.permute.xlu1 %1034 }
 0xf25   :  { %1032 = vrot.lane.b32.xlu0 %v2019_v45, %s1710_s0 }
 0xf29   :  { %1036 = vrot.lane.b32.xlu0 %v1973_v63, %s1710_s0  ;;  %v1039_v63 = vpop.permute.xlu1 %1038 }
 0xf2d   :  { %1040 = vrot.lane.b32.xlu0 %v1929_v1, %s1710_s0  ;;  %v1043_v44 = vpop.permute.xlu1 %1042 }
 0xf31   :  { %1166 = vrot.lane.b32.xlu0 %v1018_v48, %s1709_s7 }
 0xf93   :  { %v1029_v39 = vpop.permute.xlu0 %1028 }
 0xf94   :  { %1393 = vmatprep.mubr.msk.f32.mxu0 %vm1044_vm1, %v1029_v39 }
 0xf95   :  { %1394 = vmatmul.mubr.msk.f32.vlgmr.msra.gmra.mrb[14].mxu0 %vm1044_vm1, %v1031_v30 }
 0xf96   :  { %1580 = vmatpush3.bf16.msra.mxu0 %v1577_v38 }
 0xf97   :  { %v1033_v1 = vpop.permute.xlu0 %1032  ;;  %1582 = vmatprep.subr.bf16.mxu0 %v1581_v53 }
 0xf98   :  { %1396 = vmatprep.mubr.msk.f32.mxu0 %vm1044_vm1, %v1033_v1 }
 0xf99   :  { %1397 = vmatmul.mubr.msk.f32.gmra.mrb[16].mxu0 %vm1044_vm1, %v1035_v61 }
 0xf9a   :  { %1584 = vmatpush3.bf16.msra.mxu0 %v1581_v53 }
 0xf9b   :  { %v1037_v40 = vpop.permute.xlu0 %1036 }
 0xf9c   :  { %1399 = vmatprep.mubr.msk.f32.mxu0 %vm1044_vm1, %v1037_v40 }
 0xf9d   :  { %1400 = vmatmul.mubr.msk.f32.gmra.mrb[18].mxu0 %vm1044_vm1, %v1039_v63 }
 0xf9f   :  { %v1041_v43 = vpop.permute.xlu0 %1040 }
 0xfa0   :  { %1402 = vmatprep.mubr.msk.f32.mxu0 %vm1044_vm1, %v1041_v43 }
 0xfa1   :  { %1403 = vmatmul.mubr.msk.f32.gmra.mrb[20].mxu0 %vm1044_vm1, %v1043_v44 }
 0xfa2   :  { %1413 = vmatprep.mubr.msk.f32.mxu0 %vm1044_vm1, %v1901_v34  ;;  %v1360_v34 = vld [vmem:[%s2142_s8] ss:$0 sm:$0xff] }
 0xfa3   :  { %v1167_v45 = vpop.permute.xlu0 %1166 }
 0xfa5   :  { %1414 = vmatmul.mubr.msk.f32.vlgmr.msra.gmra.mrb[14].mxu0 %vm1044_vm1, %v1933_v11 }
 0xfa6   :  { %1416 = vmatprep.mubr.msk.f32.mxu0 %vm1044_vm1, %v1955_v37 }
 0xfa9   :  { %1417 = vmatmul.mubr.msk.f32.gmra.mrb[16].mxu0 %vm1044_vm1, %v1977_v7 }
 0xfaa   :  { %1419 = vmatprep.mubr.msk.f32.mxu0 %vm1044_vm1, %v2000_v29 }
 0xfad   :  { %1420 = vmatmul.mubr.msk.f32.gmra.mrb[18].mxu0 %vm1044_vm1, %v2023_v46 }
 0xfae   :  { %1422 = vmatprep.mubr.msk.f32.mxu0 %vm1044_vm1, %v2035_v17 }
 0xfb1   :  { %1423 = vmatmul.mubr.msk.f32.gmra.mrb[20].mxu0 %vm1044_vm1, %v1167_v45 }
0x1078   :  { %v1415_v11 = vpop.f32.mrb[14].mxu0 }
0x1079   :  { %v1297_v37 = vadd.f32 %v1415_v11, %v1360_v34  ;;  %v1250_v7 = vpop.f32.mrb[15].mxu0 }
0x107a   :  { %v1296_v62 = vadd.f32 %v1360_v34, %v1250_v7 }
0x107b   :  { %1306 = vst.msk [vmem:[%s2143_s9 + $0x8] sm:$0xff] %vm1304_vm2, %v1297_v37 }
0x107c   :  { %1305 = vst.msk [vmem:[%s2143_s9] sm:$0xff] %vm1304_vm2, %v1296_v62  ;;  %v1418_v29 = vpop.f32.mrb[16].mxu0 }
0x107d   :  { %v1299_v46 = vadd.f32 %v1418_v29, %v1360_v34  ;;  %v1260_v47 = vpop.f32.mrb[17].mxu0 }
0x107e   :  { %v1298_v50 = vadd.f32 %v1360_v34, %v1260_v47 }
0x107f   :  { %1308 = vst.msk [vmem:[%s2143_s9 + $0x18] sm:$0xff] %vm1304_vm2, %v1299_v46 }
0x1080   :  { %1307 = vst.msk [vmem:[%s2143_s9 + $0x10] sm:$0xff] %vm1304_vm2, %v1298_v50  ;;  %v1421_v51 = vpop.f32.mrb[18].mxu0 }
0x1081   :  { %v1301_v52 = vadd.f32 %v1421_v51, %v1360_v34  ;;  %v1270_v54 = vpop.f32.mrb[19].mxu0 }
0x1082   :  { %v1300_v55 = vadd.f32 %v1360_v34, %v1270_v54 }
0x1083   :  { %1310 = vst.msk [vmem:[%s2143_s9 + $0x28] sm:$0xff] %vm1304_vm2, %v1301_v52 }
0x1084   :  { %1309 = vst.msk [vmem:[%s2143_s9 + $0x20] sm:$0xff] %vm1304_vm2, %v1300_v55  ;;  %v1424_v27 = vpop.f32.mrb[20].mxu0 }
0x1085   :  { %v1303_v57 = vadd.f32 %v1424_v27, %v1360_v34  ;;  %v1280_v59 = vpop.f32.mrb[21].mxu0 }
0x1086   :  { %v1302_v60 = vadd.f32 %v1360_v34, %v1280_v59 }
0x1087   :  { %1312 = vst.msk [vmem:[%s2143_s9 + $0x38] sm:$0xff] %vm1304_vm2, %v1303_v57 }
0x1088   :  { %1311 = vst.msk [vmem:[%s2143_s9 + $0x30] sm:$0xff] %vm1304_vm2, %v1302_v60 }
0x1089   :  { %1317 = vsyncpa [#allocation3], 1 }
0x108a   :  { %1318 = vsyncpa [#allocation5], 1 }

</bundles_post_ra>
